<compile_context>
chip_gen: v7x
topology: tpu7x:2x2x1
jax: 0.10.0
libtpu: 0.0.40
codegen_flags: <defaults>
</compile_context>

<pallas_src>
import math
import functools

import jax
import jax.numpy as jnp
from jax.experimental import pallas as pl
from jax.experimental.pallas import tpu as pltpu

# ---------------- model hyper-params (small, consistent with the module) ----
B = 2          # batch
S = 8          # sequence length
E = 48         # embedding_dim (module default)
H = 4          # num_heads      (module default)
DH = E // H    # head dim = 12
MLP = 256      # mlp_size (small stand-in for 3072)
LN_EPS = 1e-5


def _encoder_kernel(x_ref, vec_ref, wqkv_ref, wo3_ref, b1_ref, w1_ref, w2_ref,
                    o_ref, *, heads, head_dim):
    x = x_ref[...]                                   # (S, E) f32 (one sequence)
    vecs = vec_ref[...]                              # (9, E) f32 packed params
    ln1g, ln1b = vecs[0:1], vecs[1:2]
    ln2g, ln2b = vecs[2:3], vecs[3:4]
    bq, bk, bv = vecs[4:5], vecs[5:6], vecs[6:7]
    bo, b2 = vecs[7:8], vecs[8:9]

    # ---- LayerNorm 1 (biased variance, like torch.nn.LayerNorm) ----
    mu = jnp.mean(x, axis=-1, keepdims=True)
    var = jnp.mean((x - mu) ** 2, axis=-1, keepdims=True)
    xn = (x - mu) * jax.lax.rsqrt(var + LN_EPS)
    xn = (xn * ln1g + ln1b).astype(jnp.bfloat16)     # (S, E) bf16

    # ---- Q/K/V projections: three lane-aligned (E, E) dots (bf16 MXU, f32 acc)
    # 1/sqrt(DH) is already folded into the Q weight / bias.
    wq, wk, wv = wqkv_ref[0], wqkv_ref[1], wqkv_ref[2]          # (E, E) bf16
    q = jnp.dot(xn, wq, preferred_element_type=jnp.float32) + bq
    k = jnp.dot(xn, wk, preferred_element_type=jnp.float32) + bk
    v = jnp.dot(xn, wv, preferred_element_type=jnp.float32) + bv

    qb = q.astype(jnp.bfloat16)
    kb = k.astype(jnp.bfloat16)
    vb = v.astype(jnp.bfloat16)

    # One relayout up front: split heads along a new leading (batch) axis.
    def split_heads(t):                               # (S, E) -> (H, S, DH)
        return jnp.stack(
            [t[:, h * head_dim:(h + 1) * head_dim] for h in range(heads)],
            axis=0)
    qh, kh, vh = split_heads(qb), split_heads(kb), split_heads(vb)

    # ---- batched scaled dot-product attention over all heads at once ----
    scores = jnp.einsum('hqd,hkd->hqk', qh, kh,
                        preferred_element_type=jnp.float32)      # (H, S, S) f32
    m = jnp.max(scores, axis=-1, keepdims=True)
    p = jnp.exp(scores - m)
    p = p * pl.reciprocal(jnp.sum(p, axis=-1, keepdims=True), approx=True)
    ctx = jnp.einsum('hqk,hkd->hqd', p.astype(jnp.bfloat16), vh,
                     preferred_element_type=jnp.float32)         # (H, S, DH)

    # ---- attention out-projection with the head merge folded into the weight:
    # wo3[h, d, :] = W_o.T[h*DH + d, :], so sum_h (ctx_h @ wo3_h) == ctx @ W_o.T
    attn_h = jnp.einsum('hqd,hdo->hqo', ctx.astype(jnp.bfloat16), wo3_ref[...],
                        preferred_element_type=jnp.float32)      # (H, S, E)
    attn = jnp.sum(attn_h, axis=0) + bo                          # (S, E)
    x1 = attn + x                                                # residual 1

    # ---- LayerNorm 2 ----
    mu2 = jnp.mean(x1, axis=-1, keepdims=True)
    var2 = jnp.mean((x1 - mu2) ** 2, axis=-1, keepdims=True)
    xn2 = ((x1 - mu2) * jax.lax.rsqrt(var2 + LN_EPS) * ln2g + ln2b)
    xn2 = xn2.astype(jnp.bfloat16)

    # ---- MLP: Linear -> GELU(exact erf, f32) -> Linear, + residual ----
    h1 = jnp.dot(xn2, w1_ref[...],
                 preferred_element_type=jnp.float32) + b1_ref[...]   # (S, MLP)
    g = 0.5 * h1 * (1.0 + jax.lax.erf(h1 * (1.0 / math.sqrt(2.0))))
    y = jnp.dot(g.astype(jnp.bfloat16), w2_ref[...],
                preferred_element_type=jnp.float32) + b2             # (S, E)

    o_ref[...] = (y + x1).astype(o_ref.dtype)


def transformer_encoder_block(x, kp):
    """x: (B, S, E) float32.  kp: kernel params (packed, bf16 weights)."""
    Bz, Sz, Ez = x.shape
    heads, head_dim = H, Ez // H
    xf = x.reshape(Bz * Sz, Ez)                       # rows = tokens
    kernel = functools.partial(_encoder_kernel, heads=heads, head_dim=head_dim)

    # rough cost estimate (matmul flops, exp/erf transcendentals, HBM bytes)
    flops = Bz * (3 * 2 * Sz * Ez * Ez            # qkv projections
                  + 2 * 2 * heads * Sz * Sz * head_dim   # scores + ctx
                  + 2 * Sz * Ez * Ez              # out-proj
                  + 2 * 2 * Sz * Ez * MLP)        # both MLP linears
    transcendentals = Bz * (heads * Sz * Sz + Sz * MLP)
    bytes_accessed = (2 * Bz * Sz * Ez * 4                       # x + out (f32)
                      + (4 * Ez * Ez + 2 * Ez * MLP) * 2         # bf16 weights
                      + 9 * Ez * 4 + MLP * 4)                    # packed vectors

    out = pl.pallas_call(
        kernel,
        out_shape=jax.ShapeDtypeStruct((Bz * Sz, Ez), x.dtype),
        grid=(Bz,),                                   # one sequence per step
        in_specs=[
            pl.BlockSpec((Sz, Ez), lambda b: (b, 0)),             # x rows
            pl.BlockSpec((9, Ez), lambda b: (0, 0)),              # packed vecs
            pl.BlockSpec((3, Ez, Ez), lambda b: (0, 0, 0)),       # Wq/Wk/Wv bf16
            pl.BlockSpec((heads, head_dim, Ez), lambda b: (0, 0, 0)),  # Wo bf16
            pl.BlockSpec((1, MLP), lambda b: (0, 0)),             # b1
            pl.BlockSpec((Ez, MLP), lambda b: (0, 0)),            # W1 bf16
            pl.BlockSpec((MLP, Ez), lambda b: (0, 0)),            # W2 bf16
        ],
        out_specs=pl.BlockSpec((Sz, Ez), lambda b: (b, 0)),
        compiler_params=pltpu.CompilerParams(
            dimension_semantics=("parallel",)),       # v7x: both TCs get work
        cost_estimate=pl.CostEstimate(flops=int(flops),
                                      transcendentals=int(transcendentals),
                                      bytes_accessed=int(bytes_accessed)),
    )(xf, kp["vecs"], kp["wqkv3"], kp["wo3"], kp["b1"], kp["w1_t"], kp["w2_t"])
    return out.reshape(Bz, Sz, Ez)


# ---------------- parameter construction ------------------------------------
def make_params(key):
    """PyTorch-convention f32 parameters (W: (out, in))."""
    ks = jax.random.split(key, 12)
    def rnd(k, shape, scale):
        return jax.random.normal(k, shape, jnp.float32) * scale
    return {
        "ln1_g": 1.0 + 0.1 * rnd(ks[8], (E,), 1.0),
        "ln1_b": 0.05 * rnd(ks[9], (E,), 1.0),
        "ln2_g": 1.0 + 0.1 * rnd(ks[10], (E,), 1.0),
        "ln2_b": 0.05 * rnd(ks[11], (E,), 1.0),
        "w_qkv": rnd(ks[0], (3 * E, E), 1.0 / math.sqrt(E)),   # in_proj_weight
        "b_qkv": rnd(ks[1], (3 * E,), 0.02),
        "w_o":   rnd(ks[2], (E, E), 1.0 / math.sqrt(E)),       # out_proj.weight
        "b_o":   rnd(ks[3], (E,), 0.02),
        "w1":    rnd(ks[4], (MLP, E), 1.0 / math.sqrt(E)),     # mlp[0].weight
        "b1":    rnd(ks[5], (MLP,), 0.02),
        "w2":    rnd(ks[6], (E, MLP), 1.0 / math.sqrt(MLP)),   # mlp[3].weight
        "b2":    rnd(ks[7], (E,), 0.02),
    }


def prep_kernel_params(p):
    """One-time prep: transpose/split linears, fold Q-scale, pack small params,
    cast matmul weights to bf16."""
    bf = jnp.bfloat16
    scale = 1.0 / math.sqrt(DH)
    w_qkv, b_qkv = p["w_qkv"], p["b_qkv"]
    wq = (w_qkv[:E] * scale).T.astype(bf)          # (E, E) — Q-scale folded
    wk = w_qkv[E:2 * E].T.astype(bf)
    wv = w_qkv[2 * E:].T.astype(bf)
    wqkv3 = jnp.stack([wq, wk, wv], axis=0)        # (3, E, E) bf16
    bq = b_qkv[:E] * scale
    bk = b_qkv[E:2 * E]
    bv = b_qkv[2 * E:]
    vecs = jnp.stack([p["ln1_g"], p["ln1_b"], p["ln2_g"], p["ln2_b"],
                      bq, bk, bv, p["b_o"], p["b2"]], axis=0)   # (9, E) f32
    wo3 = p["w_o"].T.reshape(H, DH, E).astype(bf)  # per-head rows of W_o.T
    return {
        "vecs": vecs,
        "wqkv3": wqkv3,
        "wo3": wo3,
        "b1": p["b1"].reshape(1, MLP),
        "w1_t": p["w1"].T.astype(bf),              # (E, MLP) bf16
        "w2_t": p["w2"].T.astype(bf),              # (MLP, E) bf16
    }


# ---------------- pure-JAX f32 reference (mirrors PyTorch forward) -----------
def reference(x, p):
    def ln(z, g, b):
        mu = jnp.mean(z, -1, keepdims=True)
        var = jnp.mean((z - mu) ** 2, -1, keepdims=True)
        return (z - mu) / jnp.sqrt(var + LN_EPS) * g + b

    xn = ln(x, p["ln1_g"], p["ln1_b"])
    qkv = xn @ p["w_qkv"].T + p["b_qkv"]
    q, k, v = qkv[..., :E], qkv[..., E:2 * E], qkv[..., 2 * E:]
    def split(t):  # (B,S,E) -> (B,H,S,DH)
        return t.reshape(t.shape[0], t.shape[1], H, DH).transpose(0, 2, 1, 3)
    qh, kh, vh = split(q), split(k), split(v)
    scores = jnp.einsum("bhqd,bhkd->bhqk", qh, kh) / math.sqrt(DH)
    probs = jax.nn.softmax(scores, axis=-1)
    ctx = jnp.einsum("bhqk,bhkd->bhqd", probs, vh)
    ctx = ctx.transpose(0, 2, 1, 3).reshape(x.shape)
    attn = ctx @ p["w_o"].T + p["b_o"]
    x1 = attn + x
    xn2 = ln(x1, p["ln2_g"], p["ln2_b"])
    h1 = xn2 @ p["w1"].T + p["b1"]
    g = 0.5 * h1 * (1.0 + jax.lax.erf(h1 / math.sqrt(2.0)))
    y = g @ p["w2"].T + p["b2"]
    return y + x1


if __name__ == "__main__":
    key = jax.random.PRNGKey(0)
    kx, kp_key = jax.random.split(key)
    x = jax.random.normal(kx, (B, S, E), jnp.float32)
    torch_params = make_params(kp_key)
    kernel_params = prep_kernel_params(torch_params)

    out = transformer_encoder_block(x, kernel_params)
    out = jax.block_until_ready(out)

    ref = reference(x, torch_params)
    assert out.shape == (B, S, E)
    # Tolerance loosened vs. the f32 reference: bf16 MXU operands (f32 accum)
    # and an approximate-reciprocal softmax denominator, per the perf review.
    assert jnp.allclose(out, ref, atol=5e-2, rtol=5e-2), \
        f"max err {jnp.max(jnp.abs(out - ref))}"
    print("KERNEL_OK")
</pallas_src>

<mosaic_0001>
module attributes {stable_mosaic.version = 11 : i64} {
  func.func @_encoder_kernel(%arg0: i32, %arg1: memref<8x48xf32, #tpu.memory_space<vmem>>, %arg2: memref<9x48xf32, #tpu.memory_space<vmem>>, %arg3: memref<3x48x48xbf16, #tpu.memory_space<vmem>>, %arg4: memref<4x12x48xbf16, #tpu.memory_space<vmem>>, %arg5: memref<1x256xf32, #tpu.memory_space<vmem>>, %arg6: memref<48x256xbf16, #tpu.memory_space<vmem>>, %arg7: memref<256x48xbf16, #tpu.memory_space<vmem>>, %arg8: memref<8x48xf32, #tpu.memory_space<vmem>>) attributes {dimension_semantics = [#tpu.dimension_semantics<parallel>], iteration_bounds = array<i64: 2>, scalar_prefetch = 0 : i64, scratch_operands = 0 : i64, tpu.core_type = #tpu.core_type<tc>, window_params = [{transform_indices = @transform_0, window_bounds = array<i64: 8, 48>}, {pipeline_mode = #tpu.pipeline_mode<synchronous>, transform_indices = @transform_1, window_bounds = array<i64: 9, 48>}, {pipeline_mode = #tpu.pipeline_mode<synchronous>, transform_indices = @transform_2, window_bounds = array<i64: 3, 48, 48>}, {pipeline_mode = #tpu.pipeline_mode<synchronous>, transform_indices = @transform_3, window_bounds = array<i64: 4, 12, 48>}, {pipeline_mode = #tpu.pipeline_mode<synchronous>, transform_indices = @transform_4, window_bounds = array<i64: 1, 256>}, {pipeline_mode = #tpu.pipeline_mode<synchronous>, transform_indices = @transform_5, window_bounds = array<i64: 48, 256>}, {pipeline_mode = #tpu.pipeline_mode<synchronous>, transform_indices = @transform_6, window_bounds = array<i64: 256, 48>}, {transform_indices = @transform_7, window_bounds = array<i64: 8, 48>}]} {
    %c0 = arith.constant 0 : index
    %c0_0 = arith.constant 0 : index
    %0 = vector.load %arg1[%c0, %c0_0] : memref<8x48xf32, #tpu.memory_space<vmem>>, vector<8x48xf32>
    %c0_1 = arith.constant 0 : index
    %c0_2 = arith.constant 0 : index
    %1 = vector.load %arg2[%c0_1, %c0_2] : memref<9x48xf32, #tpu.memory_space<vmem>>, vector<9x48xf32>
    %2 = vector.extract_strided_slice %1 {offsets = [0, 0], sizes = [1, 48], strides = [1, 1]} : vector<9x48xf32> to vector<1x48xf32>
    %3 = vector.extract_strided_slice %1 {offsets = [1, 0], sizes = [1, 48], strides = [1, 1]} : vector<9x48xf32> to vector<1x48xf32>
    %4 = vector.extract_strided_slice %1 {offsets = [2, 0], sizes = [1, 48], strides = [1, 1]} : vector<9x48xf32> to vector<1x48xf32>
    %5 = vector.extract_strided_slice %1 {offsets = [3, 0], sizes = [1, 48], strides = [1, 1]} : vector<9x48xf32> to vector<1x48xf32>
    %6 = vector.extract_strided_slice %1 {offsets = [4, 0], sizes = [1, 48], strides = [1, 1]} : vector<9x48xf32> to vector<1x48xf32>
    %7 = vector.extract_strided_slice %1 {offsets = [5, 0], sizes = [1, 48], strides = [1, 1]} : vector<9x48xf32> to vector<1x48xf32>
    %8 = vector.extract_strided_slice %1 {offsets = [6, 0], sizes = [1, 48], strides = [1, 1]} : vector<9x48xf32> to vector<1x48xf32>
    %9 = vector.extract_strided_slice %1 {offsets = [7, 0], sizes = [1, 48], strides = [1, 1]} : vector<9x48xf32> to vector<1x48xf32>
    %10 = vector.extract_strided_slice %1 {offsets = [8, 0], sizes = [1, 48], strides = [1, 1]} : vector<9x48xf32> to vector<1x48xf32>
    %cst = arith.constant dense<0.000000e+00> : vector<8xf32>
    %11 = vector.multi_reduction <add>, %0, %cst [1] : vector<8x48xf32> to vector<8xf32>
    %12 = vector.shape_cast %11 : vector<8xf32> to vector<8x1xf32>
    %cst_3 = arith.constant 4.800000e+01 : f32
    %13 = vector.broadcast %cst_3 : f32 to vector<8x1xf32>
    %14 = arith.divf %12, %13 : vector<8x1xf32>
    %15 = vector.broadcast %14 : vector<8x1xf32> to vector<8x48xf32>
    %16 = arith.subf %0, %15 : vector<8x48xf32>
    %17 = arith.mulf %16, %16 : vector<8x48xf32>
    %cst_4 = arith.constant dense<0.000000e+00> : vector<8xf32>
    %18 = vector.multi_reduction <add>, %17, %cst_4 [1] : vector<8x48xf32> to vector<8xf32>
    %19 = vector.shape_cast %18 : vector<8xf32> to vector<8x1xf32>
    %cst_5 = arith.constant 4.800000e+01 : f32
    %20 = vector.broadcast %cst_5 : f32 to vector<8x1xf32>
    %21 = arith.divf %19, %20 : vector<8x1xf32>
    %22 = vector.broadcast %14 : vector<8x1xf32> to vector<8x48xf32>
    %23 = arith.subf %0, %22 : vector<8x48xf32>
    %cst_6 = arith.constant 9.99999974E-6 : f32
    %24 = vector.broadcast %cst_6 : f32 to vector<8x1xf32>
    %25 = arith.addf %21, %24 : vector<8x1xf32>
    %26 = math.rsqrt %25 : vector<8x1xf32>
    %27 = vector.broadcast %26 : vector<8x1xf32> to vector<8x48xf32>
    %28 = arith.mulf %23, %27 : vector<8x48xf32>
    %29 = vector.broadcast %2 : vector<1x48xf32> to vector<8x48xf32>
    %30 = arith.mulf %28, %29 : vector<8x48xf32>
    %31 = vector.broadcast %3 : vector<1x48xf32> to vector<8x48xf32>
    %32 = arith.addf %30, %31 : vector<8x48xf32>
    %33 = arith.truncf %32 : vector<8x48xf32> to vector<8x48xbf16>
    %c0_7 = arith.constant 0 : index
    %c0_8 = arith.constant 0 : index
    %c0_9 = arith.constant 0 : index
    %34 = vector.load %arg3[%c0_7, %c0_8, %c0_9] : memref<3x48x48xbf16, #tpu.memory_space<vmem>>, vector<1x48x48xbf16>
    %35 = vector.shape_cast %34 : vector<1x48x48xbf16> to vector<48x48xbf16>
    %c1 = arith.constant 1 : index
    %c0_10 = arith.constant 0 : index
    %c0_11 = arith.constant 0 : index
    %36 = vector.load %arg3[%c1, %c0_10, %c0_11] : memref<3x48x48xbf16, #tpu.memory_space<vmem>>, vector<1x48x48xbf16>
    %37 = vector.shape_cast %36 : vector<1x48x48xbf16> to vector<48x48xbf16>
    %c2 = arith.constant 2 : index
    %c0_12 = arith.constant 0 : index
    %c0_13 = arith.constant 0 : index
    %38 = vector.load %arg3[%c2, %c0_12, %c0_13] : memref<3x48x48xbf16, #tpu.memory_space<vmem>>, vector<1x48x48xbf16>
    %39 = vector.shape_cast %38 : vector<1x48x48xbf16> to vector<48x48xbf16>
    %cst_14 = arith.constant dense<0.000000e+00> : vector<8x48xf32>
    %40 = tpu.matmul %33, %35, %cst_14 {dimension_numbers = #tpu.dot_dimension_numbers<[1], [0], [0], [1], [0, 0, 1, 1], [], []>} : vector<8x48xbf16>, vector<48x48xbf16>, vector<8x48xf32> -> vector<8x48xf32>
    %41 = vector.broadcast %6 : vector<1x48xf32> to vector<8x48xf32>
    %42 = arith.addf %40, %41 : vector<8x48xf32>
    %cst_15 = arith.constant dense<0.000000e+00> : vector<8x48xf32>
    %43 = tpu.matmul %33, %37, %cst_15 {dimension_numbers = #tpu.dot_dimension_numbers<[1], [0], [0], [1], [0, 0, 1, 1], [], []>} : vector<8x48xbf16>, vector<48x48xbf16>, vector<8x48xf32> -> vector<8x48xf32>
    %44 = vector.broadcast %7 : vector<1x48xf32> to vector<8x48xf32>
    %45 = arith.addf %43, %44 : vector<8x48xf32>
    %cst_16 = arith.constant dense<0.000000e+00> : vector<8x48xf32>
    %46 = tpu.matmul %33, %39, %cst_16 {dimension_numbers = #tpu.dot_dimension_numbers<[1], [0], [0], [1], [0, 0, 1, 1], [], []>} : vector<8x48xbf16>, vector<48x48xbf16>, vector<8x48xf32> -> vector<8x48xf32>
    %47 = vector.broadcast %8 : vector<1x48xf32> to vector<8x48xf32>
    %48 = arith.addf %46, %47 : vector<8x48xf32>
    %49 = arith.truncf %42 : vector<8x48xf32> to vector<8x48xbf16>
    %50 = arith.truncf %45 : vector<8x48xf32> to vector<8x48xbf16>
    %51 = arith.truncf %48 : vector<8x48xf32> to vector<8x48xbf16>
    %52 = vector.extract_strided_slice %49 {offsets = [0, 0], sizes = [8, 12], strides = [1, 1]} : vector<8x48xbf16> to vector<8x12xbf16>
    %53 = vector.extract_strided_slice %49 {offsets = [0, 12], sizes = [8, 12], strides = [1, 1]} : vector<8x48xbf16> to vector<8x12xbf16>
    %54 = vector.extract_strided_slice %49 {offsets = [0, 24], sizes = [8, 12], strides = [1, 1]} : vector<8x48xbf16> to vector<8x12xbf16>
    %55 = vector.extract_strided_slice %49 {offsets = [0, 36], sizes = [8, 12], strides = [1, 1]} : vector<8x48xbf16> to vector<8x12xbf16>
    %56 = vector.shape_cast %52 : vector<8x12xbf16> to vector<1x8x12xbf16>
    %57 = vector.shape_cast %53 : vector<8x12xbf16> to vector<1x8x12xbf16>
    %58 = vector.shape_cast %54 : vector<8x12xbf16> to vector<1x8x12xbf16>
    %59 = vector.shape_cast %55 : vector<8x12xbf16> to vector<1x8x12xbf16>
    %60 = tpu.concatenate %56, %57, %58, %59 in 0 : vector<1x8x12xbf16>, vector<1x8x12xbf16>, vector<1x8x12xbf16>, vector<1x8x12xbf16> -> vector<4x8x12xbf16>
    %61 = vector.extract_strided_slice %50 {offsets = [0, 0], sizes = [8, 12], strides = [1, 1]} : vector<8x48xbf16> to vector<8x12xbf16>
    %62 = vector.extract_strided_slice %50 {offsets = [0, 12], sizes = [8, 12], strides = [1, 1]} : vector<8x48xbf16> to vector<8x12xbf16>
    %63 = vector.extract_strided_slice %50 {offsets = [0, 24], sizes = [8, 12], strides = [1, 1]} : vector<8x48xbf16> to vector<8x12xbf16>
    %64 = vector.extract_strided_slice %50 {offsets = [0, 36], sizes = [8, 12], strides = [1, 1]} : vector<8x48xbf16> to vector<8x12xbf16>
    %65 = vector.shape_cast %61 : vector<8x12xbf16> to vector<1x8x12xbf16>
    %66 = vector.shape_cast %62 : vector<8x12xbf16> to vector<1x8x12xbf16>
    %67 = vector.shape_cast %63 : vector<8x12xbf16> to vector<1x8x12xbf16>
    %68 = vector.shape_cast %64 : vector<8x12xbf16> to vector<1x8x12xbf16>
    %69 = tpu.concatenate %65, %66, %67, %68 in 0 : vector<1x8x12xbf16>, vector<1x8x12xbf16>, vector<1x8x12xbf16>, vector<1x8x12xbf16> -> vector<4x8x12xbf16>
    %70 = vector.extract_strided_slice %51 {offsets = [0, 0], sizes = [8, 12], strides = [1, 1]} : vector<8x48xbf16> to vector<8x12xbf16>
    %71 = vector.extract_strided_slice %51 {offsets = [0, 12], sizes = [8, 12], strides = [1, 1]} : vector<8x48xbf16> to vector<8x12xbf16>
    %72 = vector.extract_strided_slice %51 {offsets = [0, 24], sizes = [8, 12], strides = [1, 1]} : vector<8x48xbf16> to vector<8x12xbf16>
    %73 = vector.extract_strided_slice %51 {offsets = [0, 36], sizes = [8, 12], strides = [1, 1]} : vector<8x48xbf16> to vector<8x12xbf16>
    %74 = vector.shape_cast %70 : vector<8x12xbf16> to vector<1x8x12xbf16>
    %75 = vector.shape_cast %71 : vector<8x12xbf16> to vector<1x8x12xbf16>
    %76 = vector.shape_cast %72 : vector<8x12xbf16> to vector<1x8x12xbf16>
    %77 = vector.shape_cast %73 : vector<8x12xbf16> to vector<1x8x12xbf16>
    %78 = tpu.concatenate %74, %75, %76, %77 in 0 : vector<1x8x12xbf16>, vector<1x8x12xbf16>, vector<1x8x12xbf16>, vector<1x8x12xbf16> -> vector<4x8x12xbf16>
    "tpu.trace_start"() <{level = 10 : i32, message = "hqd,hkd->hqk"}> : () -> ()
    %cst_17 = arith.constant dense<0.000000e+00> : vector<4x8x8xf32>
    %79 = tpu.matmul %60, %69, %cst_17 {dimension_numbers = #tpu.dot_dimension_numbers<[2], [2], [1], [1], [0, 0, 0, 1, 1, 1], [0], [0]>} : vector<4x8x12xbf16>, vector<4x8x12xbf16>, vector<4x8x8xf32> -> vector<4x8x8xf32>
    "tpu.trace_stop"() : () -> ()
    %cst_18 = arith.constant dense<0xFF800000> : vector<4x8xf32>
    %80 = vector.multi_reduction <maximumf>, %79, %cst_18 [2] : vector<4x8x8xf32> to vector<4x8xf32>
    %81 = vector.shape_cast %80 : vector<4x8xf32> to vector<4x8x1xf32>
    %82 = vector.broadcast %81 : vector<4x8x1xf32> to vector<4x8x8xf32>
    %83 = arith.subf %79, %82 : vector<4x8x8xf32>
    %84 = math.exp %83 : vector<4x8x8xf32>
    %cst_19 = arith.constant dense<0.000000e+00> : vector<4x8xf32>
    %85 = vector.multi_reduction <add>, %84, %cst_19 [2] : vector<4x8x8xf32> to vector<4x8xf32>
    %86 = vector.shape_cast %85 : vector<4x8xf32> to vector<4x8x1xf32>
    %87 = tpu.reciprocal %86 {approx = true} : vector<4x8x1xf32> -> vector<4x8x1xf32>
    %88 = vector.broadcast %87 : vector<4x8x1xf32> to vector<4x8x8xf32>
    %89 = arith.mulf %84, %88 : vector<4x8x8xf32>
    %90 = arith.truncf %89 : vector<4x8x8xf32> to vector<4x8x8xbf16>
    "tpu.trace_start"() <{level = 10 : i32, message = "hqk,hkd->hqd"}> : () -> ()
    %cst_20 = arith.constant dense<0.000000e+00> : vector<4x8x12xf32>
    %91 = tpu.matmul %90, %78, %cst_20 {dimension_numbers = #tpu.dot_dimension_numbers<[2], [1], [1], [2], [0, 0, 0, 1, 1, 2], [0], [0]>} : vector<4x8x8xbf16>, vector<4x8x12xbf16>, vector<4x8x12xf32> -> vector<4x8x12xf32>
    "tpu.trace_stop"() : () -> ()
    %92 = arith.truncf %91 : vector<4x8x12xf32> to vector<4x8x12xbf16>
    %c0_21 = arith.constant 0 : index
    %c0_22 = arith.constant 0 : index
    %c0_23 = arith.constant 0 : index
    %93 = vector.load %arg4[%c0_21, %c0_22, %c0_23] : memref<4x12x48xbf16, #tpu.memory_space<vmem>>, vector<4x12x48xbf16>
    "tpu.trace_start"() <{level = 10 : i32, message = "hqd,hdo->hqo"}> : () -> ()
    %cst_24 = arith.constant dense<0.000000e+00> : vector<4x8x48xf32>
    %94 = tpu.matmul %92, %93, %cst_24 {dimension_numbers = #tpu.dot_dimension_numbers<[2], [1], [1], [2], [0, 0, 0, 1, 1, 2], [0], [0]>} : vector<4x8x12xbf16>, vector<4x12x48xbf16>, vector<4x8x48xf32> -> vector<4x8x48xf32>
    "tpu.trace_stop"() : () -> ()
    %cst_25 = arith.constant dense<0.000000e+00> : vector<8x48xf32>
    %95 = vector.multi_reduction <add>, %94, %cst_25 [0] : vector<4x8x48xf32> to vector<8x48xf32>
    %96 = vector.broadcast %9 : vector<1x48xf32> to vector<8x48xf32>
    %97 = arith.addf %95, %96 : vector<8x48xf32>
    %98 = arith.addf %97, %0 : vector<8x48xf32>
    %cst_26 = arith.constant dense<0.000000e+00> : vector<8xf32>
    %99 = vector.multi_reduction <add>, %98, %cst_26 [1] : vector<8x48xf32> to vector<8xf32>
    %100 = vector.shape_cast %99 : vector<8xf32> to vector<8x1xf32>
    %cst_27 = arith.constant 4.800000e+01 : f32
    %101 = vector.broadcast %cst_27 : f32 to vector<8x1xf32>
    %102 = arith.divf %100, %101 : vector<8x1xf32>
    %103 = vector.broadcast %102 : vector<8x1xf32> to vector<8x48xf32>
    %104 = arith.subf %98, %103 : vector<8x48xf32>
    %105 = arith.mulf %104, %104 : vector<8x48xf32>
    %cst_28 = arith.constant dense<0.000000e+00> : vector<8xf32>
    %106 = vector.multi_reduction <add>, %105, %cst_28 [1] : vector<8x48xf32> to vector<8xf32>
    %107 = vector.shape_cast %106 : vector<8xf32> to vector<8x1xf32>
    %cst_29 = arith.constant 4.800000e+01 : f32
    %108 = vector.broadcast %cst_29 : f32 to vector<8x1xf32>
    %109 = arith.divf %107, %108 : vector<8x1xf32>
    %110 = vector.broadcast %102 : vector<8x1xf32> to vector<8x48xf32>
    %111 = arith.subf %98, %110 : vector<8x48xf32>
    %cst_30 = arith.constant 9.99999974E-6 : f32
    %112 = vector.broadcast %cst_30 : f32 to vector<8x1xf32>
    %113 = arith.addf %109, %112 : vector<8x1xf32>
    %114 = math.rsqrt %113 : vector<8x1xf32>
    %115 = vector.broadcast %114 : vector<8x1xf32> to vector<8x48xf32>
    %116 = arith.mulf %111, %115 : vector<8x48xf32>
    %117 = vector.broadcast %4 : vector<1x48xf32> to vector<8x48xf32>
    %118 = arith.mulf %116, %117 : vector<8x48xf32>
    %119 = vector.broadcast %5 : vector<1x48xf32> to vector<8x48xf32>
    %120 = arith.addf %118, %119 : vector<8x48xf32>
    %121 = arith.truncf %120 : vector<8x48xf32> to vector<8x48xbf16>
    %c0_31 = arith.constant 0 : index
    %c0_32 = arith.constant 0 : index
    %122 = vector.load %arg6[%c0_31, %c0_32] : memref<48x256xbf16, #tpu.memory_space<vmem>>, vector<48x256xbf16>
    %cst_33 = arith.constant dense<0.000000e+00> : vector<8x256xf32>
    %123 = tpu.matmul %121, %122, %cst_33 {dimension_numbers = #tpu.dot_dimension_numbers<[1], [0], [0], [1], [0, 0, 1, 1], [], []>} : vector<8x48xbf16>, vector<48x256xbf16>, vector<8x256xf32> -> vector<8x256xf32>
    %c0_34 = arith.constant 0 : index
    %c0_35 = arith.constant 0 : index
    %124 = vector.load %arg5[%c0_34, %c0_35] : memref<1x256xf32, #tpu.memory_space<vmem>>, vector<1x256xf32>
    %125 = vector.broadcast %124 : vector<1x256xf32> to vector<8x256xf32>
    %126 = arith.addf %123, %125 : vector<8x256xf32>
    %cst_36 = arith.constant 5.000000e-01 : f32
    %127 = vector.broadcast %cst_36 : f32 to vector<8x256xf32>
    %128 = arith.mulf %127, %126 : vector<8x256xf32>
    %cst_37 = arith.constant 0.707106769 : f32
    %129 = vector.broadcast %cst_37 : f32 to vector<8x256xf32>
    %130 = arith.mulf %126, %129 : vector<8x256xf32>
    %131 = math.erf %130 : vector<8x256xf32>
    %cst_38 = arith.constant 1.000000e+00 : f32
    %132 = vector.broadcast %cst_38 : f32 to vector<8x256xf32>
    %133 = arith.addf %132, %131 : vector<8x256xf32>
    %134 = arith.mulf %128, %133 : vector<8x256xf32>
    %135 = arith.truncf %134 : vector<8x256xf32> to vector<8x256xbf16>
    %c0_39 = arith.constant 0 : index
    %c0_40 = arith.constant 0 : index
    %136 = vector.load %arg7[%c0_39, %c0_40] : memref<256x48xbf16, #tpu.memory_space<vmem>>, vector<256x48xbf16>
    %cst_41 = arith.constant dense<0.000000e+00> : vector<8x48xf32>
    %137 = tpu.matmul %135, %136, %cst_41 {dimension_numbers = #tpu.dot_dimension_numbers<[1], [0], [0], [1], [0, 0, 1, 1], [], []>} : vector<8x256xbf16>, vector<256x48xbf16>, vector<8x48xf32> -> vector<8x48xf32>
    %138 = vector.broadcast %10 : vector<1x48xf32> to vector<8x48xf32>
    %139 = arith.addf %137, %138 : vector<8x48xf32>
    %140 = arith.addf %139, %98 : vector<8x48xf32>
    %c0_42 = arith.constant 0 : index
    %c0_43 = arith.constant 0 : index
    %141 = vector.load %arg8[%c0_42, %c0_43] : memref<8x48xf32, #tpu.memory_space<vmem>>, vector<8x48xf32>
    tpu.vector_store %arg8[%c0_42, %c0_43], %140 {strides = array<i32>} : memref<8x48xf32, #tpu.memory_space<vmem>>, vector<8x48xf32>,
    return
  }
  func.func @transform_0(%arg0: i32) -> (i32, i32) {
    %c0_i32 = arith.constant 0 : i32
    %c0_i32_0 = arith.constant 0 : i32
    return %arg0, %c0_i32 : i32, i32
  }
  func.func @transform_1(%arg0: i32) -> (i32, i32) {
    %c0_i32 = arith.constant 0 : i32
    %c0_i32_0 = arith.constant 0 : i32
    %c0_i32_1 = arith.constant 0 : i32
    return %c0_i32, %c0_i32_0 : i32, i32
  }
  func.func @transform_2(%arg0: i32) -> (i32, i32, i32) {
    %c0_i32 = arith.constant 0 : i32
    %c0_i32_0 = arith.constant 0 : i32
    %c0_i32_1 = arith.constant 0 : i32
    %c0_i32_2 = arith.constant 0 : i32
    return %c0_i32, %c0_i32_0, %c0_i32_1 : i32, i32, i32
  }
  func.func @transform_3(%arg0: i32) -> (i32, i32, i32) {
    %c0_i32 = arith.constant 0 : i32
    %c0_i32_0 = arith.constant 0 : i32
    %c0_i32_1 = arith.constant 0 : i32
    %c0_i32_2 = arith.constant 0 : i32
    return %c0_i32, %c0_i32_0, %c0_i32_1 : i32, i32, i32
  }
  func.func @transform_4(%arg0: i32) -> (i32, i32) {
    %c0_i32 = arith.constant 0 : i32
    %c0_i32_0 = arith.constant 0 : i32
    %c0_i32_1 = arith.constant 0 : i32
    return %c0_i32, %c0_i32_0 : i32, i32
  }
  func.func @transform_5(%arg0: i32) -> (i32, i32) {
    %c0_i32 = arith.constant 0 : i32
    %c0_i32_0 = arith.constant 0 : i32
    %c0_i32_1 = arith.constant 0 : i32
    return %c0_i32, %c0_i32_0 : i32, i32
  }
  func.func @transform_6(%arg0: i32) -> (i32, i32) {
    %c0_i32 = arith.constant 0 : i32
    %c0_i32_0 = arith.constant 0 : i32
    %c0_i32_1 = arith.constant 0 : i32
    return %c0_i32, %c0_i32_0 : i32, i32
  }
  func.func @transform_7(%arg0: i32) -> (i32, i32) {
    %c0_i32 = arith.constant 0 : i32
    %c0_i32_0 = arith.constant 0 : i32
    return %arg0, %c0_i32 : i32, i32
  }
}

</mosaic_0001>

<bundles_post_ra>
// kernel: tpu_custom_call.1
= control target key start
LH: loop header
LB: loop body
LE: loop exit
PB: predicated region body
PF: predicated region fallthrough
CT: control target
= control target key end

     0   :  { %12 = vsyncpa [#allocation3], 0  ;;  %s2376_s0 = inlined_call_operand.vmem [shape: f32[16,48], index: 0, kind: input, shape index: {}]   ;;  %s2377_s1 = inlined_call_operand.vmem [shape: f32[9,48], index: 1, kind: input, shape index: {}]   ;;  %s2378_s2 = inlined_call_operand.vmem [shape: bf16[3,48,48], index: 2, kind: input, shape index: {}]   ;;  %s2379_s3 = inlined_call_operand.vmem [shape: bf16[4,12,48], index: 3, kind: input, shape index: {}]   ;;  %s2380_s4 = inlined_call_operand.vmem [shape: f32[1,256], index: 4, kind: input, shape index: {}]   ;;  %s2381_s5 = inlined_call_operand.vmem [shape: bf16[48,256], index: 5, kind: input, shape index: {}]   ;;  %s2382_s6 = inlined_call_operand.vmem [shape: bf16[256,48], index: 6, kind: input, shape index: {}]   ;;  %s2383_s7 = inlined_call_operand.hbm [shape: f32[16,48], index: 7, kind: output, shape index: {}]  }
   0x1   :  { %14 = vsyncpa [#allocation3 + $0x1], 0  ;;  %s2013_s24 = smov 0   ;;  %s2015_s25 = smov 0  }
   0x2   :  { %s2017_s26 = smov 0   ;;  %s2019_s27 = smov 0  }
   0x3 LB: > { %s2034_s28 = sadd.s32 4294967295, %s1964_s27   ;;  %s1561_s29 = sadd.s32 4294967294, %s1964_s27   ;;  %s1964_s27 = sphi %s2019_s27, %s2389_s27   ;;  %s1960_s26 = sphi %s2017_s26, %s2388_s26   ;;  %s1956_s25 = sphi %s2015_s25, %s2387_s25   ;;  %s1952_s24 = sphi %s2013_s24, %s2386_s24  }
   0x4   : > { %s2038_s30 = sadd.s32 1, %s1964_s27   ;;  %s179_s8 = sadd.s32 1, %s1960_s26 }
   0x5   : > { %s176_s9 = ssub.s32 %s1964_s27, %s2038_s30  ;;  %p189_p0 = scmp.ne.s32.totalorder %s1960_s26, %s1956_s25 }
   0x6   : > { %p177_p1 = scmp.eq.s32.totalorder %s176_s9, 0  ;;  %p190_p2 = scmp.eq.s32.totalorder %s2034_s28, 1 }
   0x7   : > { %p195_p3 = scmp.ne.s32.totalorder %s1956_s25, %s1952_s24  ;;  %p196_p4 = scmp.eq.s32.totalorder %s1561_s29, 1 }
   0x8   : > { %s2049_s10 = scalar_select %p177_p1, %s1960_s26, %s179_s8  }
   0x9   : > { %p2051_p5 = por %p190_p2, %p189_p0  ;;  %p2055_p6 = por %p196_p4, %p195_p3 }
   0xa   : > { %p1564_p7 = scmp.ge.s32.totalorder %s1964_s27, 1  ;;  %p239_p8 = scmp.lt.s32.totalorder %s1964_s27, 3 }
   0xc   : > { %p240_p9 = pnand %p1564_p7, %p239_p8 }
   0xd   : > { %p270_p10 = scmp.lt.s32.totalorder (!%p240_p9), %s2034_s28, 1  ;;  %vm278_vm0 = vcmask (!%p240_p9), 392192   ;;  %v1840_v7 = vld [vmem:[%s2378_s2] sm:$0xff] (!%p240_p9)   ;;  %v1966_v8 = vmov (!%p240_p9), 0.0   ;;  %vm1967_vm1 = vmmov (!%p240_p9), 0   ;;  %v1841_v9 = vld [vmem:[%s2378_s2 + $0x8] sm:$0xff] (!%p240_p9)   ;;  %v293_v13 = vlaneseq (!%p240_p9) }
   0xe   : > { %243 = sbr.rel (%p240_p9) target bundleno = 2489 (0x9b9), region = 48  ;;  %1693 = vmatprep.subr.bf16.mxu0 (!%p240_p9), %v1966_v8  ;;  %1699 = vmatprep.mubr.msk.bf16.mxu0 (!%p240_p9), %vm1967_vm1, %v1966_v8  ;;  %v1842_v10 = vld [vmem:[%s2378_s2 + $0x10] sm:$0xff] (!%p240_p9)   ;;  %v2096_v17 = vld [vmem:[%s2377_s1] sm:$0xff] (!%p240_p9)  ;;  %v1843_v25 = vld [vmem:[%s2378_s2 + $0x18] sm:$0xff] (!%p240_p9)   ;;  %s1968_s29 = smov (!%p240_p9), 116   ;;  %vm537_vm2 = vcmask (!%p240_p9), 97280  }
   0xf   : > { %1694 = vmatpush3.bf16.msra.mxu0 (!%p240_p9), %v1840_v7  ;;  %1723 = vmatprep.subr.bf16.mxu1 (!%p240_p9), %v1966_v8  ;;  %v2090_v15 = vshrl.u32 (!%p240_p9), %v293_v13, 7  ;;  %v1844_v27 = vld [vmem:[%s2378_s2 + $0x20] sm:$0xff] (!%p240_p9)   ;;  %v1845_v28 = vld [vmem:[%s2378_s2 + $0x28] sm:$0xff] (!%p240_p9)   ;;  %v1846_v29 = vld [vmem:[%s2378_s2 + $0x30] sm:$0xff] (!%p240_p9)   ;;  %s1969_s8 = smov (!%p240_p9), 104   ;;  %s1970_s9 = smov (!%p240_p9), 92  }
  0x10   : > { %1695 = vmatprep.subr.bf16.mxu0 (!%p240_p9), %v1966_v8  ;;  %1725 = vmatprep.mubr.msk.bf16.mxu1 (!%p240_p9), %vm1967_vm1, %v1966_v8  ;;  %v1847_v30 = vld [vmem:[%s2378_s2 + $0x38] sm:$0xff] (!%p240_p9)   ;;  %v1848_v31 = vld [vmem:[%s2378_s2 + $0x40] sm:$0xff] (!%p240_p9)   ;;  %vm774_vm3 = vcmask (!%p240_p9), 1043456   ;;  %vm722_vm4 = vcmask (!%p240_p9), 64512   ;;  %vm976_vm5 = vcmask (!%p240_p9), 1045504   ;;  %s1632_s15 = sshll.u32 (!%p240_p9), %s2034_s28, 7 }
  0x11   : > { %v295_v16 = vsub.s32 (!%p240_p9), 0, %v2090_v15  ;;  %v300_v18 = vsub.s32 (!%p240_p9), 1, %v2090_v15  ;;  %v326_v32 = vsub.s32 (!%p240_p9), 4, %v2090_v15  ;;  %v391_v40 = vsub.s32 (!%p240_p9), 5, %v2090_v15  ;;  %s2333_s20 = scalar_lea.hbm (!%p240_p9), %s2383_s7, %s1632_s15 }
  0x12   : > { %v453_v53 = vsub.s32 (!%p240_p9), 6, %v2090_v15 }
  0x13   : > { %1696 = vmatpush3.bf16.msra.mxu0 (!%p240_p9), %v1841_v9  ;;  %v296_v19 = vrot.slane (!%p240_p9), %v2096_v17, %v295_v16  ;;  %v301_v22 = vrot.slane (!%p240_p9), %v2096_v17, %v300_v18  ;;  %v327_v33 = vrot.slane (!%p240_p9), %v2096_v17, %v326_v32  ;;  %v392_v41 = vrot.slane (!%p240_p9), %v2096_v17, %v391_v40 }
  0x14   : > { %1697 = vmatprep.subr.bf16.mxu0 (!%p240_p9), %v1966_v8  ;;  %v454_v55 = vrot.slane (!%p240_p9), %v2096_v17, %v453_v53 }
  0x15   : > { %s271_s13 = scalar_select %p270_p10, %s2034_s28, 1 }
  0x16   : > { %s1972_s28 = smov [#allocation2]  }
  0x17   : > { %s1566_s14 = sshll.u32 %s271_s13, 3  ;;  %1698 = vmatpush3.bf16.msra.mxu0 %v1842_v10  ;;  %s1906_s23 = sshll.u32 %s1972_s28, 4  ;;  %s1907_s23 = int_to_ptr.vmem [resolvable:$false] %s1906_s23 }
  0x18   : > { %s273_s17 = scalar_lea.vmem %s2376_s0, %s1566_s14  ;;  %1703 = vmatprep.subr.bf16.mxu0 %v1966_v8 }
  0x19   : > { %v2066_v0 = vld [vmem:[%s273_s17] sm:$0xff] }
  0x1a   : > { %v279_v1 = vsel %vm278_vm0, %v2066_v0, 0.0 }
  0x1b   : > { %280 = vadd.xlane.f32.xlu0 %v279_v1 }
  0xa8   : > { %v281_v2 = vpop.xlane.xlu0 %280 }
  0xa9   : > { %v283_v3 = vmul.f32 0.020833334, %v281_v2 }
  0xab   : > { %v284_v4 = vsub.f32 %v2066_v0, %v283_v3 }
  0xad   : > { %v285_v5 = vmul.f32 %v284_v4, %v284_v4 }
  0xaf   : > { %v286_v6 = vsel %vm278_vm0, %v285_v5, 0.0 }
  0xb0   : > { %287 = vadd.xlane.f32.xlu0 %v286_v6 }
 0x13d   : > { %v288_v11 = vpop.xlane.xlu0 %287 }
 0x13e   : > { %v289_v12 = vmul.f32 0.020833334, %v288_v11 }
 0x140   : > { %v290_v14 = vadd.f32 1e-05, %v289_v12 }
 0x142   : > { %1878 = vrsqrt.f32 %v290_v14 }
 0x14c   : > { %v1879_v20 = vpop.eup %1878 }
 0x14d   : > { %v292_v21 = vmul.f32 %v1879_v20, %v284_v4 }
 0x14f   : > { %v297_v23 = vmul.f32 %v296_v19, %v292_v21 }
 0x151   : > { %v302_v24 = vadd.f32 %v301_v22, %v297_v23 }
 0x153   : > { %v303_v26 = vpack.c.bf16 %v302_v24, %v302_v24 }
 0x155   : > { %1700 = vmatmul.mubr.msk.bf16.vlgmr.msra.gmra.mrb[0].mxu0 %vm278_vm0, %v303_v26 }
 0x156   : > { %1704 = vmatpush3.bf16.msra.mxu0 %v1843_v25  ;;  %1709 = vmatprep.mubr.msk.bf16.mxu0 %vm1967_vm1, %v1966_v8 }
 0x157   : > { %1705 = vmatprep.subr.bf16.mxu0 %v1966_v8 }
 0x15a   : > { %1706 = vmatpush3.bf16.msra.mxu0 %v1844_v27 }
 0x15b   : > { %1707 = vmatprep.subr.bf16.mxu0 %v1966_v8 }
 0x15e   : > { %1708 = vmatpush3.bf16.msra.mxu0 %v1845_v28 }
 0x15f   : > { %1713 = vmatprep.subr.bf16.mxu0 %v1966_v8 }
 0x161   : > { %1710 = vmatmul.mubr.msk.bf16.vlgmr.msra.gmra.mrb[4].mxu0 %vm278_vm0, %v303_v26 }
 0x162   : > { %1714 = vmatpush3.bf16.msra.mxu0 %v1846_v29  ;;  %1719 = vmatprep.mubr.msk.bf16.mxu0 %vm1967_vm1, %v1966_v8 }
 0x163   : > { %1715 = vmatprep.subr.bf16.mxu0 %v1966_v8 }
 0x166   : > { %1716 = vmatpush3.bf16.msra.mxu0 %v1847_v30 }
 0x167   : > { %1717 = vmatprep.subr.bf16.mxu0 %v1966_v8 }
 0x16a   : > { %1718 = vmatpush3.bf16.msra.mxu0 %v1848_v31 }
 0x16b   : > { %1735 = vmatprep.subr.bf16.mxu0 %v1966_v8 }
 0x16d   : > { %1720 = vmatmul.mubr.msk.bf16.vlgmr.msra.gmra.mrb[8].mxu0 %vm278_vm0, %v303_v26 }
 0x16e   : > { %1737 = vmatprep.mubr.msk.bf16.mxu0 %vm1967_vm1, %v1966_v8 }
 0x228   : > { %v383_v34 = vpop.f32.mrb[0].mxu0 }
 0x229   : > { %v384_v35 = vadd.f32 %v383_v34, %v327_v33  ;;  %v1701_v36 = vpop.f32.mrb[1].mxu0 }
 0x22a   : > { %v386_v37 = vpop.f32.mrb[2].mxu0 }
 0x22b   : > { %v513_v38 = vpack.c.bf16 %v384_v35, %v384_v35  ;;  %v1702_v39 = vpop.f32.mrb[3].mxu0 }
 0x22d   : > { %517 = vrot.lane.b32.xlu0 %v513_v38, %s1968_s29 }
 0x234   : > { %v445_v42 = vpop.f32.mrb[4].mxu0 }
 0x235   : > { %v446_v43 = vadd.f32 %v445_v42, %v392_v41  ;;  %v1711_v44 = vpop.f32.mrb[5].mxu0 }
 0x236   : > { %v448_v45 = vpop.f32.mrb[6].mxu0 }
 0x237   : > { %v514_v46 = vpack.c.bf16 %v446_v43, %v446_v43  ;;  %v1712_v47 = vpop.f32.mrb[7].mxu0 }
 0x239   : > { %524 = vrot.lane.b32.xlu1 %v514_v46, %s1968_s29  ;;  %v542_v48 = vsel %vm537_vm2, %v514_v46, 0 }
 0x23a   : > { %1724 = vmatpush3.bf16.xpose.msra.mxu1 %v542_v48 }
 0x23b   : > { %1729 = vmatprep.subr.bf16.mxu1 %v1966_v8 }
 0x23d   : > { %526 = vrot.lane.b32.xlu1 %v514_v46, %s1969_s8 }
 0x240   : > { %v507_v49 = vpop.f32.mrb[8].mxu0 }
 0x241   : > { %528 = vrot.lane.b32.xlu1 %v514_v46, %s1970_s9  ;;  %v1721_v50 = vpop.f32.mrb[9].mxu0  ;;  %1726 = vmatmul.mubr.msk.bf16.vlgmr.msra.gmra.mrb[0].mxu1 %vm537_vm2, %v513_v38  ;;  %v508_v58 = vadd.f32 %v507_v49, %v454_v55 }
 0x242   : > { %v510_v51 = vpop.f32.mrb[10].mxu0  ;;  %1731 = vmatprep.mubr.msk.bf16.mxu1 %vm1967_vm1, %v1966_v8 }
 0x243   : > { %v1722_v52 = vpop.f32.mrb[11].mxu0  ;;  %v2159_v62 = vpack.c.bf16 %v508_v58, %v508_v58 }
 0x245   : > { %519 = vrot.lane.b32.xlu1 %v513_v38, %s1969_s8  ;;  %v776_v2 = vsel %vm774_vm3, %v2159_v62, 0 }
 0x249   : > { %521 = vrot.lane.b32.xlu1 %v513_v38, %s1970_s9 }
 0x29f   : > { %v518_v60 = vpop.permute.xlu0 %517 }
 0x2ab   : > { %v525_v54 = vpop.permute.xlu1 %524 }
 0x2ac   : > { %v588_v56 = vsel %vm537_vm2, %v525_v54, 0 }
 0x2ad   : > { %1730 = vmatpush3.bf16.xpose.msra.mxu1 %v588_v56 }
 0x2ae   : > { %1741 = vmatprep.subr.bf16.mxu1 %v1966_v8 }
 0x2af   : > { %v527_v57 = vpop.permute.xlu1 %526 }
 0x2b0   : > { %v634_v59 = vsel %vm537_vm2, %v527_v57, 0 }
 0x2b1   : > { %1736 = vmatpush3.bf16.xpose.msra.mxu0 %v634_v59 }
 0x2b2   : > { %1747 = vmatprep.subr.bf16.mxu0 %v1966_v8 }
 0x2b3   : > { %v529_v61 = vpop.permute.xlu1 %528 }
 0x2b4   : > { %v680_v63 = vsel %vm537_vm2, %v529_v61, 0  ;;  %1732 = vmatmul.mubr.msk.bf16.vlgmr.msra.gmra.mrb[4].mxu1 %vm537_vm2, %v518_v60 }
 0x2b5   : > { %1742 = vmatpush3.bf16.xpose.msra.mxu1 %v680_v63  ;;  %1743 = vmatprep.mubr.msk.bf16.mxu1 %vm1967_vm1, %v1966_v8 }
 0x2b6   : > { %1753 = vmatprep.subr.bf16.mxu1 %v1966_v8 }
 0x2b7   : > { %v520_v1 = vpop.permute.xlu1 %519 }
 0x2b8   : > { %1738 = vmatmul.mubr.msk.bf16.vlgmr.msra.gmra.mrb[12].mxu0 %vm537_vm2, %v520_v1 }
 0x2b9   : > { %1748 = vmatpush3.bf16.msra.mxu0 %v776_v2  ;;  %1749 = vmatprep.mubr.msk.bf16.mxu0 %vm1967_vm1, %v1966_v8 }
 0x2ba   : > { %1759 = vmatprep.subr.bf16.mxu0 %v1966_v8 }
 0x2bb   : > { %v522_v3 = vpop.permute.xlu1 %521 }
 0x2bc   : > { %1744 = vmatmul.mubr.msk.bf16.vlgmr.msra.gmra.mrb[8].mxu1 %vm537_vm2, %v522_v3 }
 0x2bd   : > { %1755 = vmatprep.mubr.msk.bf16.mxu1 %vm1967_vm1, %v1966_v8 }
 0x314   : > { %v578_v4 = vpop.f32.mrb[0].mxu1 }
 0x315   : > { %v1727_v5 = vpop.f32.mrb[1].mxu1  ;;  %v723_v6 = vsel %vm722_vm4, %v578_v4, -inf }
 0x316   : > { %724 = vmax.xlane.f32.xlu1 %v723_v6  ;;  %v581_v7 = vpop.f32.mrb[2].mxu1 }
 0x317   : > { %v1728_v9 = vpop.f32.mrb[3].mxu1 }
 0x387   : > { %v624_v10 = vpop.f32.mrb[4].mxu1 }
 0x388   : > { %v1733_v11 = vpop.f32.mrb[5].mxu1  ;;  %v726_v12 = vsel %vm722_vm4, %v624_v10, -inf }
 0x389   : > { %727 = vmax.xlane.f32.xlu0 %v726_v12  ;;  %v627_v13 = vpop.f32.mrb[6].mxu1  ;;  %v1850_v11 = vld [vmem:[%s2379_s3 + $0x8] sm:$0x3f]  }
 0x38a   : > { %v1734_v14 = vpop.f32.mrb[7].mxu1  ;;  %v1029_v12 = vsel %vm976_vm5, %v1850_v11, 0  ;;  %v1851_v13 = vld [vmem:[%s2379_s3 + $0x10] sm:$0x3f]   ;;  %v1855_v11 = vld [vmem:[%s2381_s5 + $0x4] ss:$8 sps:$4 sm:$0xff]  }
 0x38b   : > { %v670_v19 = vpop.f32.mrb[12].mxu0 }
 0x38c   : > { %v1739_v20 = vpop.f32.mrb[13].mxu0  ;;  %v729_v21 = vsel %vm722_vm4, %v670_v19, -inf }
 0x38d   : > { %730 = vmax.xlane.f32.xlu1 %v729_v21  ;;  %v673_v22 = vpop.f32.mrb[14].mxu0  ;;  %v1080_v21 = vsel %vm976_vm5, %v1851_v13, 0  ;;  %v1856_v13 = vld [vmem:[%s2381_s5 + $0x10] ss:$8 sps:$4 sm:$0xff]  }
 0x38e   : > { %v1740_v23 = vpop.f32.mrb[15].mxu0 }
 0x38f   : > { %v716_v24 = vpop.f32.mrb[8].mxu1 }
 0x390   : > { %v1745_v25 = vpop.f32.mrb[9].mxu1  ;;  %v732_v26 = vsel %vm722_vm4, %v716_v24, -inf }
 0x391   : > { %v719_v27 = vpop.f32.mrb[10].mxu1  ;;  %733 = vmax.xlane.f32.xlu1 %v732_v26 }
 0x392   : > { %v1746_v28 = vpop.f32.mrb[11].mxu1 }
 0x3a3   : > { %v725_v29 = vpop.xlane.xlu1 %724 }
 0x3a4   : > { %v735_v30 = vsub.f32 %v578_v4, %v725_v29 }
 0x3a6   : > { %v739_v31 = vmul.f32 1.442695, %v735_v30 }
 0x3a8   : > { %1880 = vpow2.f32 %v739_v31 }
 0x3b2   : > { %v1881_v32 = vpop.eup %1880 }
 0x3b3   : > { %v747_v33 = vsel %vm722_vm4, %v1881_v32, 0.0 }
 0x3b4   : > { %748 = vadd.xlane.f32.xlu0 %v747_v33 }
 0x416   : > { %v728_v34 = vpop.xlane.xlu0 %727 }
 0x417   : > { %v736_v35 = vsub.f32 %v624_v10, %v728_v34 }
 0x419   : > { %v741_v36 = vmul.f32 1.442695, %v736_v35 }
 0x41a   : > { %v731_v37 = vpop.xlane.xlu1 %730 }
 0x41b   : > { %1882 = vpow2.f32 %v741_v36  ;;  %v737_v38 = vsub.f32 %v670_v19, %v731_v37 }
 0x41d   : > { %v743_v39 = vmul.f32 1.442695, %v737_v38 }
 0x41e   : > { %v734_v45 = vpop.xlane.xlu1 %733 }
 0x41f   : > { %1884 = vpow2.f32 %v743_v39  ;;  %v738_v46 = vsub.f32 %v716_v24, %v734_v45  ;;  %v1852_v24 = vld [vmem:[%s2379_s3 + $0x18] sm:$0x3f]  }
 0x420   : > { %v1131_v28 = vsel %vm976_vm5, %v1852_v24, 0  ;;  %v1865_v24 = vld [vmem:[%s2382_s6 + $0x8] sm:$0xff]  }
 0x421   : > { %v745_v47 = vmul.f32 1.442695, %v738_v46 }
 0x425   : > { %v1883_v40 = vpop.eup %1882 }
 0x426   : > { %v750_v41 = vsel %vm722_vm4, %v1883_v40, 0.0 }
 0x427   : > { %751 = vadd.xlane.f32.xlu1 %v750_v41 }
 0x429   : > { %v1885_v42 = vpop.eup %1884 }
 0x42a   : > { %v753_v43 = vsel %vm722_vm4, %v1885_v42, 0.0 }
 0x42b   : > { %754 = vadd.xlane.f32.xlu0 %v753_v43 }
 0x438   : > { %533 = vrot.lane.b32.xlu1 %v2159_v62, %s1969_s8  ;;  %s267_s8 = sand.u32 1, %s1956_s25  }
 0x439   : > { %s1489_s21 = scalar_lea.sflag [#allocation3], %s267_s8 }
 0x441   : > { %v749_v44 = vpop.xlane.xlu0 %748  ;;  %531 = vrot.lane.b32.xlu0 %v2159_v62, %s1968_s29  ;;  %s1908_s29 = scalar_lea.vmem %s1907_s23, 256 }
 0x442   : > { %1886 = vrcp.f32 %v749_v44 }
 0x443   : > { %1888 = vpow2.f32 %v745_v47 }
 0x44c   : > { %v1887_v48 = vpop.eup %1886 }
 0x44d   : > { %v763_v49 = vmul.f32 %v1887_v48, %v1881_v32  ;;  %v1889_v51 = vpop.eup %1888 }
 0x44e   : > { %v756_v52 = vsel %vm722_vm4, %v1889_v51, 0.0 }
 0x44f   : > { %v767_v50 = vpack.c.bf16 %v763_v49, %v763_v49 }
 0x451   : > { %1750 = vmatmul.mubr.msk.bf16.vlgmr.msra.gmra.mrb[16].mxu0 %vm722_vm4, %v767_v50 }
 0x452   : > { %1761 = vmatprep.mubr.msk.bf16.mxu0 %vm1967_vm1, %v1966_v8 }
 0x45c   : > { %757 = vadd.xlane.f32.xlu1 %v756_v52 }
 0x46d   : > { %535 = vrot.lane.b32.xlu1 %v2159_v62, %s1970_s9  ;;  %v1849_v62 = vld [vmem:[%s2379_s3] sm:$0x3f]   ;;  %s1565_s9 = sshll.u32 %s267_s8, 3 }
 0x46e   : > { %v978_v3 = vsel %vm976_vm5, %v1849_v62, 0  ;;  %s269_s16 = scalar_lea.vmem [#allocation2], %s1565_s9 }
 0x46f   : > { %s1502_s17 = sshll.u32 %s269_s16, 4  ;;  %s2335_s17 = int_to_ptr.vmem [resolvable:$true] %s1502_s17 }
 0x470   : > { %s1902_s22 = scalar_lea.vmem %s2335_s17, 128  ;;  %p1909_p0 = scmp.lt.s32.totalorder %s2335_s17, %s1907_s23 }
 0x471   : > { %p1903_p11 = scmp.ne.s32.totalorder %s2335_s17, %s1902_s22  ;;  %p1910_p1 = scmp.lt.s32.totalorder %s1908_s29, %s1902_s22 }
 0x473   : > { %p1904_p12 = pnand %p1903_p11, %p2051_p5  ;;  %p1911_p2 = por %p1910_p1, %p1909_p0 }
 0x475   : > { %p1905_p13 = pneg %p1904_p12 }
 0x477   : > { %p1912_p3 = pnand %p1911_p2, %p1905_p13 }
 0x4b4   : > { %v752_v53 = vpop.xlane.xlu1 %751 }
 0x4b5   : > { %1890 = vrcp.f32 %v752_v53 }
 0x4b8   : > { %v755_v54 = vpop.xlane.xlu0 %754  ;;  %v534_v55 = vpop.permute.xlu1 %533 }
 0x4b9   : > { %1892 = vrcp.f32 %v755_v54  ;;  %v868_v56 = vsel %vm774_vm3, %v534_v55, 0 }
 0x4ba   : > { %1760 = vmatpush3.bf16.msra.mxu0 %v868_v56 }
 0x4bb   : > { %1771 = vmatprep.subr.bf16.mxu0 %v1966_v8 }
 0x4bc   : > { %v532_v57 = vpop.permute.xlu0 %531 }
 0x4bd   : > { %v822_v58 = vsel %vm774_vm3, %v532_v57, 0  ;;  %v1182_v57 = vsub.s32 7, %v2090_v15 }
 0x4be   : > { %1754 = vmatpush3.bf16.msra.mxu1 %v822_v58 }
 0x4bf   : > { %v1891_v59 = vpop.eup %1890  ;;  %1765 = vmatprep.subr.bf16.mxu1 %v1966_v8 }
 0x4c0   : > { %v764_v60 = vmul.f32 %v1891_v59, %v1883_v40  ;;  %v1183_v59 = vrot.slane %v2096_v17, %v1182_v57 }
 0x4c2   : > { %v768_v61 = vpack.c.bf16 %v764_v60, %v764_v60 }
 0x4c3   : > { %v1893_v63 = vpop.eup %1892 }
 0x4c4   : > { %v765_v1 = vmul.f32 %v1893_v63, %v1885_v42  ;;  %1756 = vmatmul.mubr.msk.bf16.vlgmr.msra.gmra.mrb[12].mxu1 %vm722_vm4, %v768_v61 }
 0x4c5   : > { %1767 = vmatprep.mubr.msk.bf16.mxu1 %vm1967_vm1, %v1966_v8 }
 0x4c6   : > { %v769_v2 = vpack.c.bf16 %v765_v1, %v765_v1 }
 0x4c8   : > { %1762 = vmatmul.mubr.msk.bf16.vlgmr.msra.gmra.mrb[20].mxu0 %vm722_vm4, %v769_v2 }
 0x4c9   : > { %1772 = vmatpush3.bf16.msra.mxu0 %v978_v3  ;;  %1773 = vmatprep.mubr.msk.bf16.mxu0 %vm1967_vm1, %v1966_v8 }
 0x4ca   : > { %1783 = vmatprep.subr.bf16.mxu0 %v1966_v8 }
 0x4e9   : > { %v758_v4 = vpop.xlane.xlu1 %757 }
 0x4ea   : > { %1894 = vrcp.f32 %v758_v4 }
 0x4ed   : > { %v536_v5 = vpop.permute.xlu1 %535 }
 0x4ee   : > { %v914_v6 = vsel %vm774_vm3, %v536_v5, 0 }
 0x4ef   : > { %1766 = vmatpush3.bf16.msra.mxu1 %v914_v6 }
 0x4f0   : > { %1777 = vmatprep.subr.bf16.mxu1 %v1966_v8 }
 0x4f4   : > { %v1895_v7 = vpop.eup %1894 }
 0x4f5   : > { %v766_v9 = vmul.f32 %v1895_v7, %v1889_v51 }
 0x4f7   : > { %v770_v10 = vpack.c.bf16 %v766_v9, %v766_v9 }
 0x4f9   : > { %1768 = vmatmul.mubr.msk.bf16.vlgmr.msra.gmra.mrb[16].mxu1 %vm722_vm4, %v770_v10 }
 0x4fa   : > { %1779 = vmatprep.mubr.msk.bf16.mxu1 %vm1967_vm1, %v1966_v8  ;;  %1778 = vmatpush3.bf16.msra.mxu1 %v1029_v12  ;;  %v1858_v12 = vld [vmem:[%s2381_s5 + $0x14] ss:$8 sps:$4 sm:$0xff]  }
 0x4fb   : > { %1789 = vmatprep.subr.bf16.mxu1 %v1966_v8 }
 0x524   : > { %v812_v14 = vpop.f32.mrb[16].mxu0 }
 0x525   : > { %v956_v19 = vpack.c.bf16 %v812_v14, %v812_v14  ;;  %v1751_v20 = vpop.f32.mrb[17].mxu0  ;;  %v1859_v14 = vld [vmem:[%s2381_s5 + $0x20] ss:$8 sps:$4 sm:$0xff]  }
 0x526   : > { %v815_v22 = vpop.f32.mrb[18].mxu0  ;;  %v1971_v20 = vmov 0  }
 0x527   : > { %v1752_v23 = vpop.f32.mrb[19].mxu0  ;;  %1774 = vmatmul.mubr.msk.bf16.vlgmr.msra.gmra.mrb[24].mxu0 %vm537_vm2, %v956_v19  ;;  %v1861_v19 = vld [vmem:[%s2381_s5 + $0x24] ss:$8 sps:$4 sm:$0xff]  }
 0x528   : > { %1784 = vmatpush3.bf16.msra.mxu0 %v1080_v21  ;;  %1785 = vmatprep.mubr.msk.bf16.mxu0 %vm1967_vm1, %v1966_v8  ;;  %v1862_v21 = vld [vmem:[%s2382_s6 + $0x40] sm:$0xff]   ;;  %v1864_v23 = vld [vmem:[%s2382_s6 + $0x48] sm:$0xff]  }
 0x529   : > { %1261 = vmatprep.subr.bf16.mxu0 %v1855_v11  ;;  %v1863_v22 = vld [vmem:[%s2382_s6] sm:$0xff]  }
 0x597   : > { %v858_v25 = vpop.f32.mrb[12].mxu1 }
 0x598   : > { %v957_v26 = vpack.c.bf16 %v858_v25, %v858_v25  ;;  %v1757_v27 = vpop.f32.mrb[13].mxu1 }
 0x599   : > { %v861_v29 = vpop.f32.mrb[14].mxu1 }
 0x59a   : > { %v1758_v30 = vpop.f32.mrb[15].mxu1  ;;  %1780 = vmatmul.mubr.msk.bf16.vlgmr.msra.gmra.mrb[20].mxu1 %vm537_vm2, %v957_v26  ;;  %v1206_v29 = vsub.s32 3, %v2090_v15 }
 0x59b   : > { %v904_v31 = vpop.f32.mrb[20].mxu0  ;;  %1790 = vmatpush3.bf16.msra.mxu1 %v1131_v28  ;;  %1791 = vmatprep.mubr.msk.bf16.mxu1 %vm1967_vm1, %v1966_v8  ;;  %v1201_v28 = vsub.s32 2, %v2090_v15 }
 0x59c   : > { %v958_v32 = vpack.c.bf16 %v904_v31, %v904_v31  ;;  %v1763_v33 = vpop.f32.mrb[21].mxu0  ;;  %1671 = vmatprep.subr.bf16.mxu1 %v1862_v21 }
 0x59d   : > { %v907_v34 = vpop.f32.mrb[22].mxu0  ;;  %v1202_v30 = vrot.slane %v2096_v17, %v1201_v28  ;;  %v1207_v33 = vrot.slane %v2096_v17, %v1206_v29  ;;  %v1869_v17 = vld [vmem:[%s2382_s6 + $0x18] sm:$0xff]  }
 0x59e   : > { %v1764_v35 = vpop.f32.mrb[23].mxu0  ;;  %1786 = vmatmul.mubr.msk.bf16.vlgmr.msra.gmra.mrb[28].mxu0 %vm537_vm2, %v958_v32 }
 0x59f   : > { %1293 = vmatprep.mubr.bf16.mxu0 %v1971_v20 }
 0x5cc   : > { %v950_v36 = vpop.f32.mrb[16].mxu1 }
 0x5cd   : > { %v959_v37 = vpack.c.bf16 %v950_v36, %v950_v36  ;;  %v1769_v38 = vpop.f32.mrb[17].mxu1 }
 0x5ce   : > { %v953_v39 = vpop.f32.mrb[18].mxu1  ;;  %v1867_v38 = vld [vmem:[%s2382_s6 + $0x10] sm:$0xff]  }
 0x5cf   : > { %v1770_v40 = vpop.f32.mrb[19].mxu1  ;;  %1792 = vmatmul.mubr.msk.bf16.vlgmr.msra.gmra.mrb[24].mxu1 %vm537_vm2, %v959_v37  ;;  %v1866_v37 = vld [vmem:[%s2382_s6 + $0x50] sm:$0xff]   ;;  %v1868_v39 = vld [vmem:[%s2382_s6 + $0x58] sm:$0xff]  }
 0x5d0   : > { %1672 = vmatpush3.bf16.msra.mxu1 %v1863_v22  ;;  %v1870_v40 = vld [vmem:[%s2382_s6 + $0x60] sm:$0xff]  }
 0x5d1   : > { %1673 = vmatprep.subr.bf16.mxu1 %v1864_v23 }
 0x5d4   : > { %1674 = vmatpush3.bf16.msra.mxu1 %v1865_v24 }
 0x5d5   : > { %1675 = vmatprep.subr.bf16.mxu1 %v1866_v37 }
 0x5d8   : > { %1676 = vmatpush3.bf16.msra.mxu1 %v1867_v38 }
 0x5d9   : > { %1677 = vmatprep.subr.bf16.mxu1 %v1868_v39 }
 0x5dc   : > { %1678 = vmatpush3.bf16.msra.mxu1 %v1869_v17 }
 0x5dd   : > { %1679 = vmatprep.subr.bf16.mxu1 %v1870_v40 }
 0x5fa   : > { %v1014_v41 = vpop.f32.mrb[24].mxu0 }
 0x5fb   : > { %v1775_v42 = vpop.f32.mrb[25].mxu0  ;;  %v1173_v8 = vsel %vm278_vm0, %v1014_v41, 0.0  ;;  %v1871_v41 = vld [vmem:[%s2382_s6 + $0x20] sm:$0xff]  }
 0x5fc   : > { %v1017_v43 = vpop.f32.mrb[26].mxu0  ;;  %1680 = vmatpush3.bf16.msra.mxu1 %v1871_v41  ;;  %v1872_v42 = vld [vmem:[%s2382_s6 + $0x68] sm:$0xff]  }
 0x5fd   : > { %v1776_v44 = vpop.f32.mrb[27].mxu0  ;;  %v1873_v43 = vld [vmem:[%s2382_s6 + $0x28] sm:$0xff]   ;;  %1681 = vmatprep.subr.bf16.mxu1 %v1872_v42 }
 0x5fe   : > { %v1874_v44 = vld [vmem:[%s2382_s6 + $0x70] sm:$0xff]  }
 0x600   : > { %1682 = vmatpush3.bf16.msra.mxu1 %v1873_v43 }
 0x601   : > { %1683 = vmatprep.subr.bf16.mxu1 %v1874_v44 }
 0x66d   : > { %v1065_v45 = vpop.f32.mrb[20].mxu1 }
 0x66e   : > { %v1174_v46 = vsel %vm278_vm0, %v1065_v45, 0.0  ;;  %v1781_v47 = vpop.f32.mrb[21].mxu1  ;;  %v1875_v45 = vld [vmem:[%s2382_s6 + $0x30] sm:$0xff]  }
 0x66f   : > { %v1175_v48 = vadd.f32 %v1174_v46, %v1173_v8  ;;  %v1068_v49 = vpop.f32.mrb[22].mxu1  ;;  %1684 = vmatpush3.bf16.msra.mxu1 %v1875_v45  ;;  %v1876_v8 = vld [vmem:[%s2382_s6 + $0x78] sm:$0xff]   ;;  %v1216_v47 = vld [vmem:[%s2380_s4] sm:$0x3] }
 0x670   : > { %v1782_v50 = vpop.f32.mrb[23].mxu1  ;;  %v1877_v46 = vld [vmem:[%s2382_s6 + $0x38] sm:$0xff]   ;;  %1685 = vmatprep.subr.bf16.mxu1 %v1876_v8  ;;  %v1225_v49 = vrot.slane %v1216_v47, %v300_v18 }
 0x671   : > { %v1116_v51 = vpop.f32.mrb[28].mxu0 }
 0x672   : > { %v1176_v52 = vsel %vm278_vm0, %v1116_v51, 0.0  ;;  %v1787_v53 = vpop.f32.mrb[29].mxu0 }
 0x673   : > { %v1177_v54 = vadd.f32 %v1176_v52, %v1175_v48  ;;  %v1119_v55 = vpop.f32.mrb[30].mxu0  ;;  %1686 = vmatpush3.bf16.msra.mxu1 %v1877_v46  ;;  %v1221_v48 = vrot.slane %v1216_v47, %v295_v16 }
 0x674   : > { %v1788_v56 = vpop.f32.mrb[31].mxu0 }
 0x6a2   : > { %v1167_v58 = vpop.f32.mrb[24].mxu1 }
 0x6a3   : > { %v1178_v60 = vsel %vm278_vm0, %v1167_v58, 0.0  ;;  %v1793_v61 = vpop.f32.mrb[25].mxu1 }
 0x6a4   : > { %v1179_v62 = vadd.f32 %v1178_v60, %v1177_v54  ;;  %v1170_v63 = vpop.f32.mrb[26].mxu1 }
 0x6a5   : > { %v1794_v1 = vpop.f32.mrb[27].mxu1 }
 0x6a6   : > { %v1184_v2 = vadd.f32 %v1183_v59, %v1179_v62 }
 0x6a8   : > { %v2240_v3 = vadd.f32 %v1184_v2, %v2066_v0  ;;  %v1853_v0 = vld [vmem:[%s2381_s5] ss:$8 sps:$4 sm:$0xff]  }
 0x6a9   : > { %1262 = vmatpush1.bf16.msra.mxu0 %v1853_v0 }
 0x6aa   : > { %v1186_v4 = vsel %vm278_vm0, %v2240_v3, 0.0  ;;  %1263 = vmatprep.subr.bf16.mxu0 %v1858_v12 }
 0x6ab   : > { %1187 = vadd.xlane.f32.xlu0 %v1186_v4  ;;  %v1614_v4 = vld [vmem:[%s2377_s1 + $0x8] ss:$0 sm:$0xff] }
 0x6ad   : > { %1264 = vmatpush1.bf16.msra.mxu0 %v1856_v13 }
 0x6ae   : > { %1265 = vmatprep.subr.bf16.mxu0 %v1861_v19 }
 0x6b1   : > { %1266 = vmatpush1.bf16.msra.mxu0 %v1859_v14 }
 0x738   : > { %v1188_v5 = vpop.xlane.xlu0 %1187 }
 0x739   : > { %v1189_v6 = vmul.f32 0.020833334, %v1188_v5 }
 0x73b   : > { %v1190_v7 = vsub.f32 %v2240_v3, %v1189_v6 }
 0x73d   : > { %v1191_v9 = vmul.f32 %v1190_v7, %v1190_v7 }
 0x73f   : > { %v1192_v10 = vsel %vm278_vm0, %v1191_v9, 0.0 }
 0x740   : > { %1193 = vadd.xlane.f32.xlu1 %v1192_v10 }
 0x7cd   : > { %v1194_v25 = vpop.xlane.xlu1 %1193 }
 0x7ce   : > { %v1195_v26 = vmul.f32 0.020833334, %v1194_v25 }
 0x7d0   : > { %v1196_v27 = vadd.f32 1e-05, %v1195_v26 }
 0x7d2   : > { %1896 = vrsqrt.f32 %v1196_v27 }
 0x7dc   : > { %v1897_v31 = vpop.eup %1896 }
 0x7dd   : > { %v1198_v32 = vmul.f32 %v1897_v31, %v1190_v7 }
 0x7df   : > { %v1203_v34 = vmul.f32 %v1202_v30, %v1198_v32 }
 0x7e1   : > { %v1208_v35 = vadd.f32 %v1207_v33, %v1203_v34 }
 0x7e3   : > { %v1209_v36 = vpack.c.bf16 %v1208_v35, %v1208_v35 }
 0x7e5   : > { %1613 = vmatmul.mubr.msk.bf16.vlgmr.msra.gmra.mrb[32].mxu0 %vm278_vm0, %v1209_v36 }
 0x8b8   : > { %v1295_v50 = vpop.f32.mrb[32].mxu0 }
 0x8b9   : > { %v1296_v51 = vadd.f32 %v1295_v50, %v1221_v48  ;;  %v1297_v52 = vpop.f32.mrb[33].mxu0 }
 0x8ba   : > { %v1298_v53 = vadd.f32 %v1297_v52, %v1225_v49  ;;  %v1299_v54 = vpop.f32.mrb[34].mxu0 }
 0x8bb   : > { %v1304_v55 = vmul.f32 0.70710677, %v1296_v51  ;;  %v1300_v56 = vpop.f32.mrb[35].mxu0  ;;  %v1302_v60 = vmul.f32 0.5, %v1296_v51 }
 0x8bc   : > { %v1305_v57 = vmul.f32 0.70710677, %v1298_v53  ;;  %v1303_v62 = vmul.f32 0.5, %v1298_v53 }
 0x8bd   : > { %1898 = verf.f32 %v1304_v55 }
 0x8be   : > { %1900 = verf.f32 %v1305_v57 }
 0x8c7   : > { %v1899_v58 = vpop.eup %1898 }
 0x8c8   : > { %v1901_v59 = vpop.eup %1900  ;;  %v1308_v61 = vadd.f32 1.0, %v1899_v58 }
 0x8c9   : > { %v1309_v16 = vadd.f32 1.0, %v1901_v59 }
 0x8ca   : > { %v1310_v15 = vmul.f32 %v1308_v61, %v1302_v60 }
 0x8cb   : > { %v1311_v18 = vmul.f32 %v1309_v16, %v1303_v62 }
 0x8cc   : > { %v1312_v1 = vpack.c.bf16 %v1310_v15, %v1310_v15 }
 0x8cd   : > { %v1313_v63 = vpack.c.bf16 %v1311_v18, %v1311_v18 }
 0x8cf   : > { %1478 = vmatprep.mubr.bf16.mxu1 %v1313_v63 }
 0x8d0   : > { %1479 = vmatmul.mubr.bf16.vlgmr.msra.gmra.mrb[28].mxu1 %v1312_v1 }
 0x9a3   : > { %v1687_v2 = vpop.f32.mrb[28].mxu1 }
 0x9a4   : > { %v1688_v5 = vpop.f32.mrb[29].mxu1 }
 0x9a5   : > { %v1689_v6 = vadd.f32 %v1688_v5, %v1687_v2  ;;  %v1690_v7 = vpop.f32.mrb[30].mxu1 }
 0x9a6   : > { %v1691_v9 = vpop.f32.mrb[31].mxu1 }
 0x9a7   : > { %v1481_v10 = vadd.f32 %v1689_v6, %v1614_v4 }
 0x9a9   : > { %v1486_v11 = vadd.f32 %v1481_v10, %v2240_v3 }
 0x9ab   : > { %1487 = vst.msk [vmem:[%s269_s16] sm:$0xff] %vm278_vm0, %v1486_v11 }
 0x9ac   : > { %1915 = shalt.err (!%p1912_p3)
}
 0x9ad   : > { %s1916_s8 = scalar_lea.hbm %s2333_s20, 128  ;;  %s1920_s14 = scalar_lea.hbm %s2383_s7, 256 }
 0x9ae   : > { %p1917_p4 = scmp.ne.s32.totalorder %s2333_s20, %s1916_s8  ;;  %p1921_p9 = scmp.lt.u32.totalorder %s2333_s20, %s2383_s7 }
 0x9af   : > { %p1922_p10 = scmp.lt.u32.totalorder %s1920_s14, %s1916_s8  ;;  %p1924_p12 = scmp.lt.u32.totalorder %s1916_s8, %s2333_s20 }
 0x9b0   : > { %p1918_p7 = pnand %p1917_p4, %p2051_p5 }
 0x9b1   : > { %p1923_p11 = por %p1922_p10, %p1921_p9 }
 0x9b2   : > { %p1919_p8 = pneg %p1918_p7 }
 0x9b3   : > { %p1925_p13 = por %p1924_p12, %p1923_p11 }
 0x9b5   : > { %p1926_p0 = pnand %p1925_p13, %p1919_p8 }
 0x9b7   : > { %1929 = shalt.err (!%p1926_p0)
}
 0x9b8   : > { %1795 = dma.vmem_to_hbm [thread:$0]  (%p2051_p5), %s2335_s17, 128, %s2333_s20, %s1489_s21  }
 0x9b9 PF: > { %p1801_p1 = scmp.ge.s32.totalorder %s1964_s27, 2  ;;  %s1514_s18 = sand.u32 1, %s1952_s24  }
 0x9ba   : > { %s1515_s19 = scalar_lea.sflag [#allocation3], %s1514_s18 }
 0x9bb   : > { %p1798_p2 = pnand %p1801_p1, %p2055_p6 }
 0x9bd   : > { %1947 = dma.done.wait (!%p1798_p2), %s1515_s19, 128  }
 0x9be   : > { %1949 = vsyncadd (!%p1798_p2), %s1515_s19, 4294967168  ;;  %p17_p3 = scmp.ge.s32.totalorder %s2038_s30, 4   ;;  %s2386_s24 = smov %s1956_s25 }
 0x9bf   : > { %s2387_s25 = smov %s1960_s26  ;;  %s2388_s26 = smov %s2049_s10 }
 0x9c0   : > { %s2389_s27 = smov %s2038_s30  ;;  %19 = sbr.rel (!%p17_p3) target bundleno = 3 (0x3), region = 85 }
 0x9c7   :  { %1520 = vsyncpa [#allocation3], 1 }
 0x9c8   :  { %1522 = vsyncpa [#allocation3 + $0x1], 1 }

</bundles_post_ra>
